<compile_context>
chip_gen: v5e
topology: v5e:2x2
jax: 0.10.0
libtpu: 0.0.40
codegen_flags: <defaults>
</compile_context>

<pallas_src>
import functools

import jax
import jax.numpy as jnp
from jax import lax
from jax.experimental import pallas as pl
from jax.experimental.pallas import tpu as pltpu


def _round_up(v: int, m: int) -> int:
    return ((v + m - 1) // m) * m


def _cdiv(a: int, b: int) -> int:
    return (a + b - 1) // b


def _col_index(i: int, j: int, order: int) -> int:
    """Column index of the a^i * b^j term (matches the PyTorch double loop)."""
    return i * (order + 1) - (i * (i - 1)) // 2 + j


def _prop_apc1_kernel(x_ref, w_ref, o_ref, *, order: int, chunk: int,
                      num_chunks: int):
    """Horner-evaluated polynomial map for one lane-dense N-tile.

    x_ref: (2, TILE_N) f32   rows = (x0, x1) raw inputs, batch on lanes
    w_ref: (6, P)      f32   weights with input scalings and bias pre-folded
    o_ref: (6, TILE_N)       output (transposed back to (N, 6) in the wrapper)
    TILE_N = chunk * num_chunks; chunk is a multiple of 128.
    """
    nout, ncols = w_ref.shape            # (6, P)

    # Hoist the tiny (6,1) weight-column loads out of the chunk loop.
    w_cols = [w_ref[:, k:k + 1] for k in range(ncols)]

    def compute_chunk(start):
        a = x_ref[0:1, pl.ds(start, chunk)]            # (1, chunk)
        b = x_ref[1:2, pl.ds(start, chunk)]            # (1, chunk)
        # One explicit sublane-broadcast each; reused by every MAC below
        # (avoids re-materializing the broadcast per op).
        a6 = jnp.broadcast_to(a, (nout, chunk))        # (6, chunk)
        b6 = jnp.broadcast_to(b, (nout, chunk))        # (6, chunk)

        # out = sum_i a^i * P_i(b),  P_i(b) = sum_j w'[:, idx(i,j)] * b^j
        # evaluated as nested Horner (outer in a, inner in b).
        acc = None
        for i in range(order, -1, -1):
            nj = order - i
            base = _col_index(i, 0, order)
            p = w_cols[base + nj]                      # (6, 1) leading coeff
            for j in range(nj - 1, -1, -1):
                p = p * b6 + w_cols[base + j]          # (6, chunk)
            acc = p if acc is None else acc * a6 + p   # (6, chunk)

        acc = jnp.broadcast_to(acc, (nout, chunk))     # no-op unless order == 0
        o_ref[:, pl.ds(start, chunk)] = acc.astype(o_ref.dtype)

    if num_chunks == 1:
        compute_chunk(0)
    else:
        def body(c, carry):
            compute_chunk(pl.multiple_of(c * chunk, chunk))
            return carry
        lax.fori_loop(0, num_chunks, body, 0)


def _choose_tiling(n: int, tile_n_max: int, chunk_max: int):
    """Pick (tile_n, chunk, num_chunks): chunk | tile_n, both multiples of 128."""
    n_r = _round_up(max(n, 1), 128)
    chunk = min(chunk_max, n_r)                     # multiple of 128
    if n_r <= chunk:
        return chunk, chunk, 1                      # single tile, single chunk
    tile_cap = max(chunk, (tile_n_max // chunk) * chunk)
    # Use >=2 tiles so v7x's two TensorCores both get work for mid-size N.
    half = _round_up(_cdiv(n_r, 2), chunk)
    tile_n = max(chunk, min(half, tile_cap))
    return tile_n, chunk, tile_n // chunk


@functools.partial(
    jax.jit,
    static_argnames=("order", "tile_n_max", "chunk_max", "out_dtype"))
def prop_apc1_forward(x, weight, bias, *, order: int, tile_n_max: int = 32768,
                      chunk_max: int = 1024, out_dtype=jnp.float32):
    """JAX wrapper matching PropAPC1.forward.

    x:      (N, 2) or (2,) float32
    weight: (6, P) float32   (PyTorch nn.Linear layout), P = (order+1)(order+2)/2
    bias:   (6,)   float32
    returns (N, 6) out_dtype (default float32)
    """
    if x.ndim == 1:
        x = x.reshape(1, x.shape[0])
    n = x.shape[0]
    p = (order + 1) * (order + 2) // 2
    assert weight.shape == (6, p), (weight.shape, p)

    # Fold the 1/10000 and 1/100 input scalings and the bias into the weights:
    # w'[:, idx(i,j)] = w[:, idx(i,j)] * 1e-4^i * 1e-2^j;  w'[:, 0] += bias.
    scales = []
    for i in range(order + 1):
        for j in range(order - i + 1):
            scales.append((1.0 / 10000.0) ** i * (1.0 / 100.0) ** j)
    scales = jnp.asarray(scales, dtype=jnp.float32)
    w_eff = weight.astype(jnp.float32) * scales[None, :]
    w_eff = w_eff.at[:, 0].add(bias.astype(jnp.float32))

    # Lane-dense layout: batch on the last (lane) axis.
    x_t = x.astype(jnp.float32).T                       # (2, N)

    tile_n, chunk, num_chunks = _choose_tiling(n, tile_n_max, chunk_max)
    n_pad = _round_up(n, tile_n)
    if n_pad != n:
        x_t = jnp.pad(x_t, ((0, 0), (0, n_pad - n)))
    grid = (n_pad // tile_n,)

    kernel = functools.partial(_prop_apc1_kernel, order=order,
                               chunk=chunk, num_chunks=num_chunks)
    out_t = pl.pallas_call(
        kernel,
        out_shape=jax.ShapeDtypeStruct((6, n_pad), out_dtype),
        grid=grid,
        in_specs=[
            pl.BlockSpec((2, tile_n), lambda i: (0, i)),   # x tile (lane-dense)
            pl.BlockSpec((6, p), lambda i: (0, 0)),        # folded weights
        ],
        out_specs=pl.BlockSpec((6, tile_n), lambda i: (0, i)),
        compiler_params=pltpu.CompilerParams(
            dimension_semantics=("parallel",),             # v7x: shard N over TCs
        ),
    )(x_t, w_eff)

    return out_t[:, :n].T                                  # (N, 6)


def prop_apc1_reference(x, weight, bias, *, order: int):
    """Pure-JAX reference mirroring the PyTorch forward (same term ordering)."""
    if x.ndim == 1:
        x = x.reshape(1, x.shape[0])
    a = x[:, 0] / 10000.0
    b = x[:, 1] / 100.0
    cols = []
    for i in range(order + 1):
        for j in range(order - i + 1):
            cols.append((a ** i) * (b ** j))
    feats = jnp.stack(cols, axis=1)                        # (N, P)
    return feats @ weight.T + bias


if __name__ == "__main__":
    order = 3
    p = (order + 1) * (order + 2) // 2                     # 10 power combinations

    key = jax.random.PRNGKey(0)
    kx0, kx1, kx2, kw, kb = jax.random.split(key, 5)

    # Input ranges chosen so normalized features (x0/1e4, x1/1e2) are O(1).
    def make_x(k, n):
        k0, k1 = jax.random.split(k)
        c0 = jax.random.uniform(k0, (n,), jnp.float32, 0.0, 10000.0)
        c1 = jax.random.uniform(k1, (n,), jnp.float32, 0.0, 200.0)
        return jnp.stack([c0, c1], axis=1)

    # Spec init: weight zero-initialized; also test a nonzero weight so the
    # polynomial/linear path is actually exercised.
    weight_zero = jnp.zeros((6, p), dtype=jnp.float32)
    weight_rand = 0.1 * jax.random.normal(kw, (6, p), dtype=jnp.float32)
    bound = 1.0 / (p ** 0.5)
    bias = jax.random.uniform(kb, (6,), jnp.float32, -bound, bound)

    # n=300: single tile / single chunk + padded tail.
    # n=5000: 2 grid blocks (v7x megacore path) x 3 inner chunks + padded tail.
    for n, kx in ((300, kx0), (5000, kx1)):
        x = make_x(kx, n)
        for weight in (weight_zero, weight_rand):
            out = jax.block_until_ready(
                prop_apc1_forward(x, weight, bias, order=order))
            ref = prop_apc1_reference(x, weight, bias, order=order)
            assert out.shape == (n, 6)
            assert jnp.allclose(out, ref, atol=1e-4, rtol=1e-4), \
                f"mismatch vs reference (n={n})"

    # Also exercise the 1-D input path.
    x1d = make_x(kx2, 1)[0]
    out1d = jax.block_until_ready(
        prop_apc1_forward(x1d, weight_rand, bias, order=order))
    ref1d = prop_apc1_reference(x1d, weight_rand, bias, order=order)
    assert out1d.shape == (1, 6)
    assert jnp.allclose(out1d, ref1d, atol=1e-4, rtol=1e-4)

    print("KERNEL_OK")
</pallas_src>

<mosaic_0001>
module attributes {stable_mosaic.version = 11 : i64} {
  func.func @_prop_apc1_kernel(%arg0: i32, %arg1: memref<2x384xf32, #tpu.memory_space<vmem>>, %arg2: memref<6x10xf32, #tpu.memory_space<vmem>>, %arg3: memref<6x384xf32, #tpu.memory_space<vmem>>) attributes {dimension_semantics = [#tpu.dimension_semantics<parallel>], iteration_bounds = array<i64: 1>, scalar_prefetch = 0 : i64, scratch_operands = 0 : i64, tpu.core_type = #tpu.core_type<tc>, window_params = [{transform_indices = @transform_0, window_bounds = array<i64: 2, 384>}, {pipeline_mode = #tpu.pipeline_mode<synchronous>, transform_indices = @transform_1, window_bounds = array<i64: 6, 10>}, {transform_indices = @transform_2, window_bounds = array<i64: 6, 384>}]} {
    %c0 = arith.constant 0 : index
    %c0_0 = arith.constant 0 : index
    %0 = vector.load %arg2[%c0, %c0_0] : memref<6x10xf32, #tpu.memory_space<vmem>>, vector<6x1xf32>
    %c0_1 = arith.constant 0 : index
    %c1 = arith.constant 1 : index
    %1 = vector.load %arg2[%c0_1, %c1] : memref<6x10xf32, #tpu.memory_space<vmem>>, vector<6x1xf32>
    %c0_2 = arith.constant 0 : index
    %c2 = arith.constant 2 : index
    %2 = vector.load %arg2[%c0_2, %c2] : memref<6x10xf32, #tpu.memory_space<vmem>>, vector<6x1xf32>
    %c0_3 = arith.constant 0 : index
    %c3 = arith.constant 3 : index
    %3 = vector.load %arg2[%c0_3, %c3] : memref<6x10xf32, #tpu.memory_space<vmem>>, vector<6x1xf32>
    %c0_4 = arith.constant 0 : index
    %c4 = arith.constant 4 : index
    %4 = vector.load %arg2[%c0_4, %c4] : memref<6x10xf32, #tpu.memory_space<vmem>>, vector<6x1xf32>
    %c0_5 = arith.constant 0 : index
    %c5 = arith.constant 5 : index
    %5 = vector.load %arg2[%c0_5, %c5] : memref<6x10xf32, #tpu.memory_space<vmem>>, vector<6x1xf32>
    %c0_6 = arith.constant 0 : index
    %c6 = arith.constant 6 : index
    %6 = vector.load %arg2[%c0_6, %c6] : memref<6x10xf32, #tpu.memory_space<vmem>>, vector<6x1xf32>
    %c0_7 = arith.constant 0 : index
    %c7 = arith.constant 7 : index
    %7 = vector.load %arg2[%c0_7, %c7] : memref<6x10xf32, #tpu.memory_space<vmem>>, vector<6x1xf32>
    %c0_8 = arith.constant 0 : index
    %c8 = arith.constant 8 : index
    %8 = vector.load %arg2[%c0_8, %c8] : memref<6x10xf32, #tpu.memory_space<vmem>>, vector<6x1xf32>
    %c0_9 = arith.constant 0 : index
    %c9 = arith.constant 9 : index
    %9 = vector.load %arg2[%c0_9, %c9] : memref<6x10xf32, #tpu.memory_space<vmem>>, vector<6x1xf32>
    %c0_10 = arith.constant 0 : index
    %c0_11 = arith.constant 0 : index
    %10 = vector.load %arg1[%c0_10, %c0_11] : memref<2x384xf32, #tpu.memory_space<vmem>>, vector<1x384xf32>
    %c1_12 = arith.constant 1 : index
    %c0_13 = arith.constant 0 : index
    %11 = vector.load %arg1[%c1_12, %c0_13] : memref<2x384xf32, #tpu.memory_space<vmem>>, vector<1x384xf32>
    %12 = vector.shape_cast %10 : vector<1x384xf32> to vector<1x384xf32>
    %13 = vector.broadcast %12 : vector<1x384xf32> to vector<6x384xf32>
    %14 = vector.shape_cast %11 : vector<1x384xf32> to vector<1x384xf32>
    %15 = vector.broadcast %14 : vector<1x384xf32> to vector<6x384xf32>
    %16 = vector.broadcast %8 : vector<6x1xf32> to vector<6x384xf32>
    %17 = arith.mulf %16, %15 : vector<6x384xf32>
    %18 = vector.broadcast %7 : vector<6x1xf32> to vector<6x384xf32>
    %19 = arith.addf %17, %18 : vector<6x384xf32>
    %20 = vector.broadcast %9 : vector<6x1xf32> to vector<6x384xf32>
    %21 = arith.mulf %20, %13 : vector<6x384xf32>
    %22 = arith.addf %21, %19 : vector<6x384xf32>
    %23 = vector.broadcast %6 : vector<6x1xf32> to vector<6x384xf32>
    %24 = arith.mulf %23, %15 : vector<6x384xf32>
    %25 = vector.broadcast %5 : vector<6x1xf32> to vector<6x384xf32>
    %26 = arith.addf %24, %25 : vector<6x384xf32>
    %27 = arith.mulf %26, %15 : vector<6x384xf32>
    %28 = vector.broadcast %4 : vector<6x1xf32> to vector<6x384xf32>
    %29 = arith.addf %27, %28 : vector<6x384xf32>
    %30 = arith.mulf %22, %13 : vector<6x384xf32>
    %31 = arith.addf %30, %29 : vector<6x384xf32>
    %32 = vector.broadcast %3 : vector<6x1xf32> to vector<6x384xf32>
    %33 = arith.mulf %32, %15 : vector<6x384xf32>
    %34 = vector.broadcast %2 : vector<6x1xf32> to vector<6x384xf32>
    %35 = arith.addf %33, %34 : vector<6x384xf32>
    %36 = arith.mulf %35, %15 : vector<6x384xf32>
    %37 = vector.broadcast %1 : vector<6x1xf32> to vector<6x384xf32>
    %38 = arith.addf %36, %37 : vector<6x384xf32>
    %39 = arith.mulf %38, %15 : vector<6x384xf32>
    %40 = vector.broadcast %0 : vector<6x1xf32> to vector<6x384xf32>
    %41 = arith.addf %39, %40 : vector<6x384xf32>
    %42 = arith.mulf %31, %13 : vector<6x384xf32>
    %43 = arith.addf %42, %41 : vector<6x384xf32>
    %c0_14 = arith.constant 0 : index
    %c0_15 = arith.constant 0 : index
    %44 = vector.load %arg3[%c0_14, %c0_15] : memref<6x384xf32, #tpu.memory_space<vmem>>, vector<6x384xf32>
    tpu.vector_store %arg3[%c0_14, %c0_15], %43 {strides = array<i32>} : memref<6x384xf32, #tpu.memory_space<vmem>>, vector<6x384xf32>,
    return
  }
  func.func @transform_0(%arg0: i32) -> (i32, i32) {
    %c0_i32 = arith.constant 0 : i32
    %c0_i32_0 = arith.constant 0 : i32
    return %c0_i32, %arg0 : i32, i32
  }
  func.func @transform_1(%arg0: i32) -> (i32, i32) {
    %c0_i32 = arith.constant 0 : i32
    %c0_i32_0 = arith.constant 0 : i32
    %c0_i32_1 = arith.constant 0 : i32
    return %c0_i32, %c0_i32_0 : i32, i32
  }
  func.func @transform_2(%arg0: i32) -> (i32, i32) {
    %c0_i32 = arith.constant 0 : i32
    %c0_i32_0 = arith.constant 0 : i32
    return %c0_i32, %arg0 : i32, i32
  }
}

</mosaic_0001>

<bundles_post_ra>
// kernel: prop_apc1_forward.1
= control target key start
LH: loop header
LB: loop body
LE: loop exit
PB: predicated region body
PF: predicated region fallthrough
CT: control target
= control target key end

     0   :  { %v153_v0 = vmov 6   ;;  %v154_v1 = vmov 8   ;;  %v155_v3 = vmov 9   ;;  %v156_v4 = vmov 3   ;;  %s196_s1 = inlined_call_operand.vmem [shape: f32[6,10], index: 1, kind: input, shape index: {}]   ;;  %s197_s0 = inlined_call_operand.vmem [shape: f32[2,384], index: 0, kind: input, shape index: {}]   ;;  %s198_s2 = inlined_call_operand.vmem [shape: f32[6,384], index: 2, kind: output, shape index: {}]  }
   0x1   :  { %144 = vset.pattern.permute.xlu1 %v153_v0  ;;  %142 = vset.pattern.permute.xlu0 %v154_v1  ;;  %v11_v2 = vld [vmem:[%s196_s1] sm:$0x3f]  ;;  %v157_v5 = vmov 7   ;;  %v158_v6 = vmov 5   ;;  %v159_v7 = vmov 2   ;;  %v160_v8 = vmov 1  }
   0x2   :  { %55 = vperm.xlu1 %144, %v11_v2   ;;  %31 = vperm.xlu0 %142, %v11_v2   ;;  %v161_v9 = vmov 4   ;;  %v162_v10 = vmov 0   ;;  %v131_v14 = vld [vmem:[%s197_s0 + $0x1] ss:$2 sm:$0x7] }
   0x3   :  { %146 = vset.pattern.permute.xlu2 %v155_v3  ;;  %v23_v15 = vperm.slane %v131_v14, 0  ;;  %v12_v16 = vld [vmem:[%s197_s0] ss:$2 sm:$0x7]  ;;  %v24_v17 = vperm.slane %v131_v14, 1  ;;  %v25_v18 = vperm.slane %v131_v14, 2 }
   0x4   :  { %45 = vperm.xlu2 %146, %v11_v2   ;;  %v16_v20 = vperm.slane %v12_v16, 0  ;;  %v17_v23 = vperm.slane %v12_v16, 1  ;;  %v18_v28 = vperm.slane %v12_v16, 2 }
   0xa   :  { %145 = vset.pattern.permute.xlu1 %v156_v4  ;;  %143 = vset.pattern.permute.xlu0 %v157_v5 }
   0xb   :  { %85 = vperm.xlu1 %145, %v11_v2   ;;  %38 = vperm.xlu0 %143, %v11_v2  }
   0xc   :  { %147 = vset.pattern.permute.xlu2 %v158_v6 }
   0xd   :  { %62 = vperm.xlu2 %147, %v11_v2  }
  0x13   :  { %148 = vset.pattern.permute.xlu1 %v159_v7  ;;  %150 = vset.pattern.permute.xlu0 %v160_v8 }
  0x14   :  { %92 = vperm.xlu1 %148, %v11_v2   ;;  %102 = vperm.xlu0 %150, %v11_v2  }
  0x15   :  { %149 = vset.pattern.permute.xlu2 %v161_v9 }
  0x16   :  { %72 = vperm.xlu2 %149, %v11_v2  }
  0x1c   :  { %151 = vset.pattern.permute.xlu1 %v162_v10  ;;  %152 = vset.pattern.permute.xlu0 %v162_v10 }
  0x1d   :  { %112 = vperm.xlu1 %151, %v11_v2  }
  0x5e   :  { %v46_v11 = vpop.permute.xlu2 %45 }
  0x5f   :  { %v48_v33 = vmul.f32 %v46_v11, %v16_v20  ;;  %v49_v36 = vmul.f32 %v46_v11, %v17_v23  ;;  %v50_v38 = vmul.f32 %v46_v11, %v18_v28 }
  0x67   :  { %v63_v19 = vpop.permute.xlu2 %62 }
  0x70   :  { %v73_v44 = vpop.permute.xlu2 %72 }
  0x74   :  { %v56_v12 = vpop.permute.xlu1 %55  ;;  %v32_v13 = vpop.permute.xlu0 %31 }
  0x75   :  { %v58_v21 = vmul.f32 %v56_v12, %v23_v15  ;;  %v34_v22 = vmul.f32 %v32_v13, %v23_v15  ;;  %v59_v24 = vmul.f32 %v56_v12, %v24_v17  ;;  %v35_v25 = vmul.f32 %v32_v13, %v24_v17 }
  0x76   :  { %v60_v29 = vmul.f32 %v56_v12, %v25_v18  ;;  %v36_v30 = vmul.f32 %v32_v13, %v25_v18 }
  0x77   :  { %v65_v34 = vadd.f32 %v63_v19, %v58_v21  ;;  %v66_v37 = vadd.f32 %v63_v19, %v59_v24 }
  0x78   :  { %v67_v39 = vadd.f32 %v63_v19, %v60_v29 }
  0x79   :  { %v68_v42 = vmul.f32 %v65_v34, %v23_v15  ;;  %v69_v45 = vmul.f32 %v66_v37, %v24_v17 }
  0x7a   :  { %v70_v49 = vmul.f32 %v67_v39, %v25_v18 }
  0x7b   :  { %v75_v56 = vadd.f32 %v73_v44, %v68_v42  ;;  %v76_v59 = vadd.f32 %v73_v44, %v69_v45 }
  0x7c   :  { %v77_v63 = vadd.f32 %v73_v44, %v70_v49 }
  0x7d   :  { %v86_v26 = vpop.permute.xlu1 %85  ;;  %v39_v27 = vpop.permute.xlu0 %38 }
  0x7e   :  { %v41_v31 = vadd.f32 %v39_v27, %v34_v22  ;;  %v42_v32 = vadd.f32 %v39_v27, %v35_v25  ;;  %v43_v35 = vadd.f32 %v39_v27, %v36_v30  ;;  %v88_v46 = vmul.f32 %v86_v26, %v23_v15 }
  0x7f   :  { %v89_v47 = vmul.f32 %v86_v26, %v24_v17  ;;  %v90_v48 = vmul.f32 %v86_v26, %v25_v18 }
  0x80   :  { %v51_v40 = vadd.f32 %v48_v33, %v41_v31  ;;  %v52_v41 = vadd.f32 %v49_v36, %v42_v32  ;;  %v53_v43 = vadd.f32 %v50_v38, %v43_v35 }
  0x82   :  { %v78_v50 = vmul.f32 %v51_v40, %v16_v20  ;;  %v79_v52 = vmul.f32 %v52_v41, %v17_v23  ;;  %v80_v57 = vmul.f32 %v53_v43, %v18_v28 }
  0x84   :  { %v81_v0 = vadd.f32 %v78_v50, %v75_v56  ;;  %v82_v4 = vadd.f32 %v79_v52, %v76_v59  ;;  %v83_v5 = vadd.f32 %v80_v57, %v77_v63 }
  0x86   :  { %v93_v51 = vpop.permute.xlu1 %92  ;;  %v103_v58 = vpop.permute.xlu0 %102  ;;  %v118_v10 = vmul.f32 %v81_v0, %v16_v20  ;;  %v119_v11 = vmul.f32 %v82_v4, %v17_v23  ;;  %v120_v16 = vmul.f32 %v83_v5, %v18_v28 }
  0x87   :  { %v95_v53 = vadd.f32 %v93_v51, %v88_v46  ;;  %v96_v54 = vadd.f32 %v93_v51, %v89_v47  ;;  %v97_v55 = vadd.f32 %v93_v51, %v90_v48 }
  0x89   :  { %v98_v60 = vmul.f32 %v95_v53, %v23_v15  ;;  %v99_v61 = vmul.f32 %v96_v54, %v24_v17  ;;  %v100_v62 = vmul.f32 %v97_v55, %v25_v18 }
  0x8b   :  { %v105_v1 = vadd.f32 %v103_v58, %v98_v60  ;;  %v106_v2 = vadd.f32 %v103_v58, %v99_v61  ;;  %v107_v3 = vadd.f32 %v103_v58, %v100_v62 }
  0x8d   :  { %v108_v6 = vmul.f32 %v105_v1, %v23_v15  ;;  %v109_v7 = vmul.f32 %v106_v2, %v24_v17  ;;  %v110_v8 = vmul.f32 %v107_v3, %v25_v18 }
  0x8f   :  { %v113_v9 = vpop.permute.xlu1 %112 }
  0x90   :  { %v115_v12 = vadd.f32 %v113_v9, %v108_v6  ;;  %v116_v13 = vadd.f32 %v113_v9, %v109_v7  ;;  %v117_v14 = vadd.f32 %v113_v9, %v110_v8 }
  0x92   :  { %v121_v19 = vadd.f32 %v118_v10, %v115_v12  ;;  %v122_v21 = vadd.f32 %v119_v11, %v116_v13  ;;  %v123_v22 = vadd.f32 %v120_v16, %v117_v14 }
  0x94   :  { %124 = vst [vmem:[%s198_s2] sm:$0x3f] %v121_v19 }
  0x95   :  { %125 = vst [vmem:[%s198_s2 + $0x8] sm:$0x3f] %v122_v21 }
  0x96   :  { %126 = vst [vmem:[%s198_s2 + $0x10] sm:$0x3f] %v123_v22 }

</bundles_post_ra>
